<compile_context>
chip_gen: v5e
topology: v5e:2x2
jax: 0.10.0
libtpu: 0.0.40
codegen_flags: <defaults>
</compile_context>

<pallas_src>
import jax
import jax.numpy as jnp
from jax.experimental import pallas as pl
from jax.experimental.pallas import tpu as pltpu


def _add_kernel(a_ref, b_ref, o_ref):
    # Full-tile elementwise add on the VPU (lane-dense stores).
    o_ref[...] = a_ref[...] + b_ref[...]


def _sublanes_for(dtype):
    # One vreg packs 8 sublanes of 32-bit words; sub-32-bit dtypes pack more
    # rows per vreg (f32 -> 8, bf16 -> 16, int8 -> 32).
    itemsize = jnp.dtype(dtype).itemsize
    if itemsize in (1, 2, 4):
        return 8 * (4 // itemsize)
    return 8


def _slab_shape(n, dtype):
    s = _sublanes_for(dtype)
    if n % s == 0:
        return (s, n // s)          # pad-free, sublane-aligned slab
    return (1, n)                   # fallback: still a valid full-array block


@jax.jit
def pallas_add(x545, x531):
    assert x545.shape == x531.shape
    assert x545.dtype == x531.dtype

    orig_shape = x545.shape
    n = x545.size
    rows, cols = _slab_shape(n, x545.dtype)

    # Contiguous reshapes only — no padding, no slicing, no extra HBM traffic.
    a = jnp.reshape(x545, (rows, cols))
    b = jnp.reshape(x531, (rows, cols))

    out = pl.pallas_call(
        _add_kernel,
        out_shape=jax.ShapeDtypeStruct((rows, cols), x545.dtype),
        in_specs=[
            pl.BlockSpec(memory_space=pltpu.VMEM),
            pl.BlockSpec(memory_space=pltpu.VMEM),
        ],
        out_specs=pl.BlockSpec(memory_space=pltpu.VMEM),
    )(a, b)

    return jnp.reshape(out, orig_shape)


if __name__ == "__main__":
    key = jax.random.PRNGKey(0)
    k1, k2 = jax.random.split(key)
    # Shapes consistent with the module: [1, 344, 7, 7] float32
    x545 = jax.random.normal(k1, (1, 344, 7, 7), dtype=jnp.float32)
    x531 = jax.random.normal(k2, (1, 344, 7, 7), dtype=jnp.float32)

    out = pallas_add(x545, x531)
    jax.block_until_ready(out)

    # Correctness check against plain JAX reference.
    ref = x545 + x531
    assert out.shape == (1, 344, 7, 7)
    assert out.dtype == jnp.float32
    assert jnp.allclose(out, ref, atol=1e-6, rtol=1e-6)

    print("KERNEL_OK")
</pallas_src>

<mosaic_0001>
module attributes {stable_mosaic.version = 11 : i64} {
  func.func @_add_kernel(%arg0: memref<8x2107xf32, #tpu.memory_space<vmem>>, %arg1: memref<8x2107xf32, #tpu.memory_space<vmem>>, %arg2: memref<8x2107xf32, #tpu.memory_space<vmem>>) attributes {dimension_semantics = [], scalar_prefetch = 0 : i64, scratch_operands = 0 : i64, tpu.core_type = #tpu.core_type<tc>} {
    %c0 = arith.constant 0 : index
    %c0_0 = arith.constant 0 : index
    %0 = vector.load %arg0[%c0, %c0_0] : memref<8x2107xf32, #tpu.memory_space<vmem>>, vector<8x2107xf32>
    %c0_1 = arith.constant 0 : index
    %c0_2 = arith.constant 0 : index
    %1 = vector.load %arg1[%c0_1, %c0_2] : memref<8x2107xf32, #tpu.memory_space<vmem>>, vector<8x2107xf32>
    %2 = arith.addf %0, %1 : vector<8x2107xf32>
    %c0_3 = arith.constant 0 : index
    %c0_4 = arith.constant 0 : index
    %3 = vector.load %arg2[%c0_3, %c0_4] : memref<8x2107xf32, #tpu.memory_space<vmem>>, vector<8x2107xf32>
    tpu.vector_store %arg2[%c0_3, %c0_4], %2 {strides = array<i32>} : memref<8x2107xf32, #tpu.memory_space<vmem>>, vector<8x2107xf32>,
    return
  }
}

</mosaic_0001>

<bundles_post_ra>
// kernel: pallas_add.1
= control target key start
LH: loop header
LB: loop body
LE: loop exit
PB: predicated region body
PF: predicated region fallthrough
CT: control target
= control target key end

     0   :  { %vm78_vm0 = vcmask 482304   ;;  %s252_s0 = inlined_call_operand.vmem [shape: f32[8,2107], index: 0, kind: input, shape index: {}]   ;;  %s253_s1 = inlined_call_operand.vmem [shape: f32[8,2107], index: 1, kind: input, shape index: {}]   ;;  %s254_s2 = inlined_call_operand.vmem [shape: f32[8,2107], index: 2, kind: output, shape index: {}]  }
   0x1   :  { %v11_v0 = vld [vmem:[%s252_s0] sm:$0xff]  ;;  %v12_v2 = vld [vmem:[%s252_s0 + $0x8] sm:$0xff]  ;;  %v13_v5 = vld [vmem:[%s252_s0 + $0x10] sm:$0xff] }
   0x2   :  { %v28_v1 = vld [vmem:[%s253_s1] sm:$0xff]  ;;  %v29_v4 = vld [vmem:[%s253_s1 + $0x8] sm:$0xff]  ;;  %v30_v6 = vld [vmem:[%s253_s1 + $0x10] sm:$0xff] }
   0x3   :  { %v45_v3 = vadd.f32 %v28_v1, %v11_v0  ;;  %v46_v7 = vadd.f32 %v29_v4, %v12_v2  ;;  %v47_v8 = vadd.f32 %v30_v6, %v13_v5  ;;  %v14_v9 = vld [vmem:[%s252_s0 + $0x18] sm:$0xff]  ;;  %v15_v11 = vld [vmem:[%s252_s0 + $0x20] sm:$0xff]  ;;  %v16_v14 = vld [vmem:[%s252_s0 + $0x28] sm:$0xff] }
   0x4   :  { %v31_v10 = vld [vmem:[%s253_s1 + $0x18] sm:$0xff]  ;;  %v32_v13 = vld [vmem:[%s253_s1 + $0x20] sm:$0xff]  ;;  %v33_v15 = vld [vmem:[%s253_s1 + $0x28] sm:$0xff] }
   0x5   :  { %62 = vst [vmem:[%s254_s2] sm:$0xff] %v45_v3  ;;  %v48_v12 = vadd.f32 %v31_v10, %v14_v9  ;;  %v49_v16 = vadd.f32 %v32_v13, %v15_v11  ;;  %v50_v17 = vadd.f32 %v33_v15, %v16_v14  ;;  %v17_v18 = vld [vmem:[%s252_s0 + $0x30] sm:$0xff]  ;;  %v18_v20 = vld [vmem:[%s252_s0 + $0x38] sm:$0xff]  ;;  %v19_v23 = vld [vmem:[%s252_s0 + $0x40] sm:$0xff] }
   0x6   :  { %63 = vst [vmem:[%s254_s2 + $0x8] sm:$0xff] %v46_v7  ;;  %v34_v19 = vld [vmem:[%s253_s1 + $0x30] sm:$0xff]  ;;  %v35_v22 = vld [vmem:[%s253_s1 + $0x38] sm:$0xff]  ;;  %v36_v24 = vld [vmem:[%s253_s1 + $0x40] sm:$0xff] }
   0x7   :  { %64 = vst [vmem:[%s254_s2 + $0x10] sm:$0xff] %v47_v8  ;;  %v51_v21 = vadd.f32 %v34_v19, %v17_v18  ;;  %v52_v25 = vadd.f32 %v35_v22, %v18_v20  ;;  %v20_v26 = vld [vmem:[%s252_s0 + $0x48] sm:$0xff]  ;;  %v21_v28 = vld [vmem:[%s252_s0 + $0x50] sm:$0xff]  ;;  %v53_v29 = vadd.f32 %v36_v24, %v19_v23  ;;  %v22_v31 = vld [vmem:[%s252_s0 + $0x58] sm:$0xff] }
   0x8   :  { %65 = vst [vmem:[%s254_s2 + $0x18] sm:$0xff] %v48_v12  ;;  %v37_v27 = vld [vmem:[%s253_s1 + $0x48] sm:$0xff]  ;;  %v38_v30 = vld [vmem:[%s253_s1 + $0x50] sm:$0xff]  ;;  %v39_v32 = vld [vmem:[%s253_s1 + $0x58] sm:$0xff] }
   0x9   :  { %66 = vst [vmem:[%s254_s2 + $0x20] sm:$0xff] %v49_v16  ;;  %v54_v33 = vadd.f32 %v37_v27, %v20_v26  ;;  %v23_v34 = vld [vmem:[%s252_s0 + $0x60] sm:$0xff]  ;;  %v55_v36 = vadd.f32 %v38_v30, %v21_v28  ;;  %v24_v37 = vld [vmem:[%s252_s0 + $0x68] sm:$0xff]  ;;  %v56_v39 = vadd.f32 %v39_v32, %v22_v31  ;;  %v25_v40 = vld [vmem:[%s252_s0 + $0x70] sm:$0xff] }
   0xa   :  { %67 = vst [vmem:[%s254_s2 + $0x28] sm:$0xff] %v50_v17  ;;  %v40_v35 = vld [vmem:[%s253_s1 + $0x60] sm:$0xff]  ;;  %v41_v38 = vld [vmem:[%s253_s1 + $0x68] sm:$0xff]  ;;  %v42_v41 = vld [vmem:[%s253_s1 + $0x70] sm:$0xff] }
   0xb   :  { %68 = vst [vmem:[%s254_s2 + $0x30] sm:$0xff] %v51_v21  ;;  %v57_v42 = vadd.f32 %v40_v35, %v23_v34  ;;  %v26_v43 = vld [vmem:[%s252_s0 + $0x78] sm:$0xff]  ;;  %v58_v45 = vadd.f32 %v41_v38, %v24_v37  ;;  %v27_v46 = vld [vmem:[%s252_s0 + $0x80] sm:$0xff]  ;;  %v59_v48 = vadd.f32 %v42_v41, %v25_v40 }
   0xc   :  { %69 = vst [vmem:[%s254_s2 + $0x38] sm:$0xff] %v52_v25  ;;  %v43_v44 = vld [vmem:[%s253_s1 + $0x78] sm:$0xff]  ;;  %v44_v47 = vld [vmem:[%s253_s1 + $0x80] sm:$0xff] }
   0xd   :  { %70 = vst [vmem:[%s254_s2 + $0x40] sm:$0xff] %v53_v29  ;;  %v60_v49 = vadd.f32 %v43_v44, %v26_v43  ;;  %v61_v50 = vadd.f32 %v44_v47, %v27_v46 }
   0xe   :  { %71 = vst [vmem:[%s254_s2 + $0x48] sm:$0xff] %v54_v33 }
   0xf   :  { %72 = vst [vmem:[%s254_s2 + $0x50] sm:$0xff] %v55_v36 }
  0x10   :  { %73 = vst [vmem:[%s254_s2 + $0x58] sm:$0xff] %v56_v39 }
  0x11   :  { %74 = vst [vmem:[%s254_s2 + $0x60] sm:$0xff] %v57_v42 }
  0x12   :  { %75 = vst [vmem:[%s254_s2 + $0x68] sm:$0xff] %v58_v45 }
  0x13   :  { %76 = vst [vmem:[%s254_s2 + $0x70] sm:$0xff] %v59_v48 }
  0x14   :  { %77 = vst [vmem:[%s254_s2 + $0x78] sm:$0xff] %v60_v49 }
  0x15   :  { %79 = vst.msk [vmem:[%s254_s2 + $0x80] sm:$0xff] %vm78_vm0, %v61_v50 }

</bundles_post_ra>
